<compile_context>
chip_gen: v7x
topology: tpu7x:2x2x1
jax: 0.10.0
libtpu: 0.0.40
codegen_flags: <defaults>
</compile_context>

<pallas_src>
import functools

import jax
import jax.numpy as jnp
from jax.experimental import pallas as pl
from jax.experimental.pallas import tpu as pltpu


def _rbfn_kernel(xa_ref, a_ref, wlin_ref, wr_ref, out_ref):
    # xa_ref  : [D+2, TN]   rows = [x^T (D rows) ; ||x||^2 ; 1]
    # a_ref   : [C,   D+2]  row j = [2*beta_j*c_j ; -beta_j ; -beta_j*||c_j||^2]
    # wlin_ref: [n_out,D+2] = [Wx | 0 | b]
    # wr_ref  : [n_out, C]  = Wr
    # out_ref : [n_out, TN]
    xa = xa_ref[...]

    # -beta * ||x - c||^2 in a single MXU matmul (lane axis = batch).
    neg_beta_dist2 = jnp.dot(a_ref[...], xa,
                             preferred_element_type=jnp.float32)     # [C, TN]
    radial = jnp.exp(neg_beta_dist2)                                  # EUP       [C, TN]

    # concat([x, radial]) @ W^T + b  ==  Wx @ x^T + b  +  Wr @ radial^T
    out = (jnp.dot(wlin_ref[...], xa, preferred_element_type=jnp.float32)
           + jnp.dot(wr_ref[...], radial, preferred_element_type=jnp.float32))
    out_ref[...] = out                                                # [n_out, TN]


@functools.partial(jax.jit, static_argnames=("block_n",))
def rbfn_forward(x, centers, beta, w, b, *, block_n=1024):
    """x: [N, D], centers: [C, D], beta: [1, C], w: [n_out, D + C], b: [n_out]."""
    N, D = x.shape
    C = centers.shape[0]
    n_out = w.shape[0]

    x = x.astype(jnp.float32)
    centers = centers.astype(jnp.float32)
    beta = beta.astype(jnp.float32)
    w = w.astype(jnp.float32)
    b = b.astype(jnp.float32)

    # ---- one-time wrapper-side layout plumbing ----
    x2 = jnp.sum(x * x, axis=1, keepdims=True)                         # [N, 1]
    xa = jnp.concatenate(
        [x, x2, jnp.ones((N, 1), jnp.float32)], axis=1).T              # [D+2, N]

    beta_c = beta.reshape(C, 1)                                        # [C, 1]
    c2 = jnp.sum(centers * centers, axis=1, keepdims=True)             # [C, 1]
    a_mat = jnp.concatenate(
        [2.0 * beta_c * centers, -beta_c, -beta_c * c2], axis=1)       # [C, D+2]

    wlin = jnp.concatenate(
        [w[:, :D], jnp.zeros((n_out, 1), jnp.float32),
         b.reshape(n_out, 1)], axis=1)                                 # [n_out, D+2]
    wr = w[:, D:]                                                      # [n_out, C]

    # ---- batch tiling: lane-dense blocks, pipelined over the grid ----
    tn = N if N <= block_n else block_n          # block_n is a multiple of 128
    grid = (pl.cdiv(N, tn),)

    # VMEM budget: double-buffered xa/out tiles + radial intermediate + weights.
    sub = 8
    tile_bytes = 4 * (2 * (D + 2) * tn                   # xa (double-buffered)
                      + C * tn                           # radial intermediate
                      + 2 * max(n_out, sub) * tn         # out (double-buffered)
                      + C * 128                          # A (lane-padded)
                      + 2 * max(n_out, sub) * max(C, 128))  # wlin, wr (padded)
    vmem_limit = int(min(max(2 * tile_bytes, 16 * 1024 * 1024), 48 * 1024 * 1024))

    cost = pl.CostEstimate(
        flops=2 * N * C * (D + 2) + 2 * N * n_out * (D + 2) + 2 * N * n_out * C,
        transcendentals=N * C,
        bytes_accessed=4 * (N * (D + 2) + C * (D + 2)
                            + n_out * (D + 2 + C) + n_out * N),
    )

    out_t = pl.pallas_call(
        _rbfn_kernel,
        out_shape=jax.ShapeDtypeStruct((n_out, N), jnp.float32),
        grid=grid,
        in_specs=[
            pl.BlockSpec((D + 2, tn), lambda i: (0, i)),      # xa: tiled over batch
            pl.BlockSpec((C, D + 2), lambda i: (0, 0)),       # A: resident in VMEM
            pl.BlockSpec((n_out, D + 2), lambda i: (0, 0)),   # Wlin: resident
            pl.BlockSpec((n_out, C), lambda i: (0, 0)),       # Wr: resident
        ],
        out_specs=pl.BlockSpec((n_out, tn), lambda i: (0, i)),
        compiler_params=pltpu.CompilerParams(
            dimension_semantics=("parallel",),                # shard over v7x's 2 TCs
            vmem_limit_bytes=vmem_limit),
        cost_estimate=cost,
    )(xa, a_mat, wlin, wr)

    return out_t.T                                            # [N, n_out]


def rbfn_reference(x, centers, beta, w, b):
    # pure-JAX reference mirroring the PyTorch code exactly (diff-squared form)
    diff = centers[None, :, :] - x[:, None, :]                # [N, C, D]
    dist2 = jnp.sum(diff * diff, axis=2)                      # [N, C]
    radial = jnp.exp(-beta * dist2)                           # [N, C]
    cat = jnp.concatenate([x, radial], axis=1)                # [N, D + C]
    return cat @ w.T + b[None, :]


if __name__ == "__main__":
    key = jax.random.PRNGKey(0)
    k_x, k_c, k_w, k_x2 = jax.random.split(key, 4)

    # Small shapes consistent with the module: N samples of dim D, C RBF centers.
    N, D, C, n_out = 8, 4, 16, 1
    x = jax.random.normal(k_x, (N, D), dtype=jnp.float32)
    centers = jax.random.normal(k_c, (C, D), dtype=jnp.float32)       # nn.Parameter(centers)
    beta = jnp.ones((1, C), dtype=jnp.float32)                        # torch.ones(1, C)
    w = 0.2 * jax.random.normal(k_w, (n_out, D + C), dtype=jnp.float32)  # normal_(0, 0.2)
    b = jnp.zeros((n_out,), dtype=jnp.float32)                        # bias zero_()

    out = jax.block_until_ready(rbfn_forward(x, centers, beta, w, b))
    ref = rbfn_reference(x, centers, beta, w, b)
    assert out.shape == (N, n_out)
    assert jnp.allclose(out, ref, atol=2e-5, rtol=2e-5), (out, ref)

    # Second run exercising the tiled multi-block path (lane-dense 128-wide blocks).
    N2 = 256
    xb = jax.random.normal(k_x2, (N2, D), dtype=jnp.float32)
    out2 = jax.block_until_ready(rbfn_forward(xb, centers, beta, w, b, block_n=128))
    ref2 = rbfn_reference(xb, centers, beta, w, b)
    assert out2.shape == (N2, n_out)
    assert jnp.allclose(out2, ref2, atol=2e-5, rtol=2e-5), (out2, ref2)

    print("KERNEL_OK")
</pallas_src>

<mosaic_0001>
module attributes {stable_mosaic.version = 11 : i64} {
  func.func @_rbfn_kernel(%arg0: i32, %arg1: memref<6x8xf32, #tpu.memory_space<vmem>>, %arg2: memref<16x6xf32, #tpu.memory_space<vmem>>, %arg3: memref<1x6xf32, #tpu.memory_space<vmem>>, %arg4: memref<1x16xf32, #tpu.memory_space<vmem>>, %arg5: memref<1x8xf32, #tpu.memory_space<vmem>>) attributes {dimension_semantics = [#tpu.dimension_semantics<parallel>], iteration_bounds = array<i64: 1>, scalar_prefetch = 0 : i64, scratch_operands = 0 : i64, tpu.core_type = #tpu.core_type<tc>, window_params = [{transform_indices = @transform_0, window_bounds = array<i64: 6, 8>}, {pipeline_mode = #tpu.pipeline_mode<synchronous>, transform_indices = @transform_1, window_bounds = array<i64: 16, 6>}, {pipeline_mode = #tpu.pipeline_mode<synchronous>, transform_indices = @transform_2, window_bounds = array<i64: 1, 6>}, {pipeline_mode = #tpu.pipeline_mode<synchronous>, transform_indices = @transform_3, window_bounds = array<i64: 1, 16>}, {transform_indices = @transform_4, window_bounds = array<i64: 1, 8>}]} {
    %c0 = arith.constant 0 : index
    %c0_0 = arith.constant 0 : index
    %0 = vector.load %arg1[%c0, %c0_0] : memref<6x8xf32, #tpu.memory_space<vmem>>, vector<6x8xf32>
    %c0_1 = arith.constant 0 : index
    %c0_2 = arith.constant 0 : index
    %1 = vector.load %arg2[%c0_1, %c0_2] : memref<16x6xf32, #tpu.memory_space<vmem>>, vector<16x6xf32>
    %cst = arith.constant dense<0.000000e+00> : vector<16x8xf32>
    %2 = tpu.matmul %1, %0, %cst {dimension_numbers = #tpu.dot_dimension_numbers<[1], [0], [0], [1], [0, 0, 1, 1], [], []>} : vector<16x6xf32>, vector<6x8xf32>, vector<16x8xf32> -> vector<16x8xf32>
    %3 = math.exp %2 : vector<16x8xf32>
    %c0_3 = arith.constant 0 : index
    %c0_4 = arith.constant 0 : index
    %4 = vector.load %arg3[%c0_3, %c0_4] : memref<1x6xf32, #tpu.memory_space<vmem>>, vector<1x6xf32>
    %cst_5 = arith.constant dense<0.000000e+00> : vector<1x8xf32>
    %5 = tpu.matmul %4, %0, %cst_5 {dimension_numbers = #tpu.dot_dimension_numbers<[1], [0], [0], [1], [0, 0, 1, 1], [], []>} : vector<1x6xf32>, vector<6x8xf32>, vector<1x8xf32> -> vector<1x8xf32>
    %c0_6 = arith.constant 0 : index
    %c0_7 = arith.constant 0 : index
    %6 = vector.load %arg4[%c0_6, %c0_7] : memref<1x16xf32, #tpu.memory_space<vmem>>, vector<1x16xf32>
    %cst_8 = arith.constant dense<0.000000e+00> : vector<1x8xf32>
    %7 = tpu.matmul %6, %3, %cst_8 {dimension_numbers = #tpu.dot_dimension_numbers<[1], [0], [0], [1], [0, 0, 1, 1], [], []>} : vector<1x16xf32>, vector<16x8xf32>, vector<1x8xf32> -> vector<1x8xf32>
    %8 = arith.addf %5, %7 : vector<1x8xf32>
    %c0_9 = arith.constant 0 : index
    %c0_10 = arith.constant 0 : index
    %9 = vector.load %arg5[%c0_9, %c0_10] : memref<1x8xf32, #tpu.memory_space<vmem>>, vector<1x8xf32>
    tpu.vector_store %arg5[%c0_9, %c0_10], %8 {strides = array<i32>} : memref<1x8xf32, #tpu.memory_space<vmem>>, vector<1x8xf32>,
    return
  }
  func.func @transform_0(%arg0: i32) -> (i32, i32) {
    %c0_i32 = arith.constant 0 : i32
    %c0_i32_0 = arith.constant 0 : i32
    return %c0_i32, %arg0 : i32, i32
  }
  func.func @transform_1(%arg0: i32) -> (i32, i32) {
    %c0_i32 = arith.constant 0 : i32
    %c0_i32_0 = arith.constant 0 : i32
    %c0_i32_1 = arith.constant 0 : i32
    return %c0_i32, %c0_i32_0 : i32, i32
  }
  func.func @transform_2(%arg0: i32) -> (i32, i32) {
    %c0_i32 = arith.constant 0 : i32
    %c0_i32_0 = arith.constant 0 : i32
    %c0_i32_1 = arith.constant 0 : i32
    return %c0_i32, %c0_i32_0 : i32, i32
  }
  func.func @transform_3(%arg0: i32) -> (i32, i32) {
    %c0_i32 = arith.constant 0 : i32
    %c0_i32_0 = arith.constant 0 : i32
    %c0_i32_1 = arith.constant 0 : i32
    return %c0_i32, %c0_i32_0 : i32, i32
  }
  func.func @transform_4(%arg0: i32) -> (i32, i32) {
    %c0_i32 = arith.constant 0 : i32
    %c0_i32_0 = arith.constant 0 : i32
    return %c0_i32, %arg0 : i32, i32
  }
}

</mosaic_0001>

<bundles_post_ra>
// kernel: rbfn_forward.1
= control target key start
LH: loop header
LB: loop body
LE: loop exit
PB: predicated region body
PF: predicated region fallthrough
CT: control target
= control target key end

     0   :  { %vm28_vm0 = vcmask 1045504   ;;  %vm21_vm1 = vcmask 48128   ;;  %s402_s0 = inlined_call_operand.vmem [shape: f32[6,8], index: 0, kind: input, shape index: {}]   ;;  %s403_s1 = inlined_call_operand.vmem [shape: f32[16,6], index: 1, kind: input, shape index: {}]   ;;  %s404_s2 = inlined_call_operand.vmem [shape: f32[1,6], index: 2, kind: input, shape index: {}]   ;;  %s405_s3 = inlined_call_operand.vmem [shape: f32[1,16], index: 3, kind: input, shape index: {}]   ;;  %s406_s4 = inlined_call_operand.hbm [shape: f32[1,8], index: 4, kind: output, shape index: {}]  }
   0x1   :  { %v18_v0 = vld [vmem:[%s402_s0] sm:$0x3f]  ;;  %v20_v2 = vld [vmem:[%s403_s1 + $0x8] sm:$0xff] }
   0x2   :  { %v19_v1 = vld [vmem:[%s403_s1] sm:$0xff]  ;;  %290 = vmatprep.subr.msk.mxu0 %vm28_vm0, %v18_v0 }
   0x3   :  { %292 = vmatprep.mubr.msk.f32.mxu0 %vm21_vm1, %v19_v1 }
   0x4   :  { %9 = vsyncpa [#allocation3], 0  ;;  %291 = vmatpush3.msk.msra.mxu0 %vm28_vm0, %v18_v0  ;;  %v343_v3 = vmov 0.0|0.0   ;;  %v344_v4 = vmov 0.0   ;;  %vm345_vm2 = vmmov 0   ;;  %vm113_vm3 = vcmask 130048  }
   0x5   :  { %293 = vmatmul.mubr.msk.f32.vlgmr.msra.gmra.mrb[0].mxu0 %vm21_vm1, %v20_v2  ;;  %307 = vmatprep.subr.bf16.mxu0 %v343_v3  ;;  %v111_v5 = vld [vmem:[%s404_s2] sm:$0x1]  ;;  %s346_s2 = smov [#allocation2]   ;;  %vm260_vm4 = vcmask 57344  }
   0x6   :  { %302 = vmatprep.subr.mxu1 %v344_v4  ;;  %299 = vmatprep.mubr.msk.f32.mxu0 %vm345_vm2, %v344_v4  ;;  %v112_v13 = vld [vmem:[%s405_s3] sm:$0x1]  ;;  %s268_s23 = sshll.u32 %s346_s2, 4  ;;  %s269_s23 = int_to_ptr.vmem [resolvable:$true] %s268_s23 }
   0x7   :  { %303 = vmatpush3.msk.msra.mxu1 %vm28_vm0, %v18_v0  ;;  %304 = vmatprep.mubr.msk.f32.mxu1 %vm345_vm2, %v344_v4  ;;  %s319_s24 = scalar_lea.vmem %s269_s23, 16  ;;  %s323_s25 = scalar_lea.vmem %s269_s23, 32 }
   0x8   :  { %305 = vmatmul.mubr.msk.f32.vlgmr.msra.gmra.mrb[0].mxu1 %vm21_vm1, %v111_v5  ;;  %p320_p0 = scmp.ne.s32.totalorder %s269_s23, %s319_s24  ;;  %p324_p1 = scmp.lt.s32.totalorder %s269_s23, %s269_s23 }
   0x9   :  { %p325_p2 = scmp.lt.s32.totalorder %s323_s25, %s319_s24 }
   0xb   :  { %p326_p3 = por %p325_p2, %p324_p1 }
   0xd   :  { %p327_p4 = pnand %p326_p3, %p320_p0 }
  0xd8   :  { %v294_v6 = vpop.f32.mrb[0].mxu0 }
  0xd9   :  { %v109_v7 = vmul.f32 1.442695, %v294_v6  ;;  %v98_v8 = vpop.f32.mrb[1].mxu0 }
  0xda   :  { %v107_v9 = vmul.f32 1.442695, %v98_v8 }
  0xdb   :  { %315 = vpow2.f32 %v109_v7  ;;  %v256_v14 = vpop.f32.mrb[0].mxu1 }
  0xdc   :  { %317 = vpow2.f32 %v107_v9  ;;  %v306_v15 = vpop.f32.mrb[1].mxu1 }
  0xe5   :  { %v316_v10 = vpop.eup %315 }
  0xe6   :  { %v318_v11 = vpop.eup %317 }
  0xe7   :  { %v308_v12 = vpack.c.bf16 %v316_v10, %v318_v11 }
  0xe9   :  { %309 = vmatpush3.bf16.msra.mxu0 %v308_v12 }
  0xec   :  { %300 = vmatmul.mubr.msk.f32.vlgmr.msra.gmra.mrb[2].mxu0 %vm113_vm3, %v112_v13 }
 0x1bf   :  { %v183_v16 = vpop.f32.mrb[2].mxu0 }
 0x1c0   :  { %v257_v17 = vadd.f32 %v256_v14, %v183_v16  ;;  %v301_v18 = vpop.f32.mrb[3].mxu0 }
 0x1c2   :  { %261 = vst.msk [vmem:[#allocation2] sm:$0x1] %vm260_vm4, %v257_v17 }
 0x1c3   :  { %330 = shalt.err (!%p327_p4)
}
 0x1c4   :  { %s331_s27 = scalar_lea.hbm %s406_s4, 16 }
 0x1c5   :  { %p332_p5 = scmp.ne.s32.totalorder %s406_s4, %s331_s27  ;;  %p335_p6 = scmp.lt.u32.totalorder %s331_s27, %s406_s4 }
 0x1c7   :  { %p337_p7 = pnand %p335_p6, %p332_p5 }
 0x1c9   :  { %340 = shalt.err (!%p337_p7)
}
 0x1ca   :  { %271 = dma.vmem_to_hbm [thread:$0]  %s269_s23, 16, %s406_s4, [#allocation3]  }
 0x1cb   :  { %341 = dma.done.wait [#allocation3], 16  }
 0x1cc   :  { %342 = vsyncadd [#allocation3], 4294967280 }
 0x1cd   :  { %275 = vsyncpa [#allocation3], 1 }

</bundles_post_ra>
